<compile_context>
chip_gen: v5e
topology: v5e:2x2
jax: 0.10.0
libtpu: 0.0.40
codegen_flags: <defaults>
</compile_context>

<pallas_src>
import jax
import jax.numpy as jnp
from jax import lax
from jax.experimental import pallas as pl
from jax.experimental.pallas import tpu as pltpu

LEAKY_SLOPE = 0.01   # F.leaky_relu default negative_slope
BN_EPS = 1e-8        # from batch_norm() in the reference module

IN_DIM, HID_DIM, OUT_DIM = 248, 64, 3
IN_PAD, HID_PAD, OUT_PAD = 256, 128, 128   # lane-dense (multiple-of-128) shapes


def _leaky_relu(x):
    return jnp.where(x >= 0, x, LEAKY_SLOPE * x)


def _batch_norm_kernel(x):
    """Whole-batch BN inside the kernel: unbiased std (ddof=1), eps'd denominator."""
    n = x.shape[0]
    mu = jnp.mean(x, axis=0, keepdims=True)
    xc = x - mu                                   # reused for var and normalize
    var = jnp.sum(xc * xc, axis=0, keepdims=True) * (1.0 / (n - 1))
    # Single rsqrt on the EUP instead of sqrt -> add -> divide on the VALU
    # critical path.  Matches (x - mu)/(std + eps) to ~1e-8 relative for real
    # lanes; zero-variance padded lanes give xc * rsqrt(eps^2) = 0 exactly.
    inv = lax.rsqrt(var + BN_EPS * BN_EPS)
    return xc * inv


def _batch_norm_ref(x):
    n = x.shape[0]
    mu = jnp.mean(x, axis=0, keepdims=True)
    var = jnp.sum((x - mu) ** 2, axis=0, keepdims=True) / (n - 1)
    std = jnp.sqrt(var)
    return (x - mu) / (std + BN_EPS)


def net_kernel(x_ref, w1_ref, b1_ref, w2_ref, b2_ref,
               w3_ref, b3_ref, w4_ref, b4_ref, o_ref):
    # TODO(synk): nn.Dropout layers are eval-mode identity here (no RNG masking).
    x = x_ref[...]

    h = jnp.dot(x, w1_ref[...], preferred_element_type=jnp.float32) + b1_ref[...]
    h = _batch_norm_kernel(_leaky_relu(h))

    h = jnp.dot(h, w2_ref[...], preferred_element_type=jnp.float32) + b2_ref[...]
    h = _batch_norm_kernel(_leaky_relu(h))

    h = jnp.dot(h, w3_ref[...], preferred_element_type=jnp.float32) + b3_ref[...]
    h = _batch_norm_kernel(_leaky_relu(h))

    # Lane-dense (B, 128) store; the wrapper slices the 3 real output columns.
    o_ref[...] = (jnp.dot(h, w4_ref[...], preferred_element_type=jnp.float32)
                  + b4_ref[...])


def _pad2(a, rows, cols):
    r, c = a.shape
    return jnp.pad(a, ((0, rows - r), (0, cols - c)))


def pad_params(params):
    """One-time zero-padding of weights/biases to lane-dense shapes (exact math)."""
    return {
        "w1": _pad2(params["w1"], IN_PAD, HID_PAD),
        "b1": _pad2(params["b1"], 1, HID_PAD),
        "w2": _pad2(params["w2"], HID_PAD, HID_PAD),
        "b2": _pad2(params["b2"], 1, HID_PAD),
        "w3": _pad2(params["w3"], HID_PAD, HID_PAD),
        "b3": _pad2(params["b3"], 1, HID_PAD),
        "w4": _pad2(params["w4"], HID_PAD, OUT_PAD),
        "b4": _pad2(params["b4"], 1, OUT_PAD),
    }


@jax.jit
def net_batchnorm_forward(x, padded):
    """Forward pass.

    x: (B, 248) for a single forward, or (G, B, 248) for G independent
       forwards fused into one pallas_call (BN stats computed per group).
    padded: output of pad_params() — pre-padded once, not per call.
    """
    squeeze = x.ndim == 2
    if squeeze:
        x = x[None]
    G, B, F = x.shape
    assert F == IN_DIM
    assert B >= 2, "batch_norm uses unbiased std (divides by B-1); need B >= 2"

    xp = jnp.pad(x, ((0, 0), (0, 0), (0, IN_PAD - F)))

    grp = lambda g: (g, 0, 0)      # per-group activation block
    fixed = lambda g: (0, 0)       # weights resident across the grid

    def w_spec(shape):
        return pl.BlockSpec(shape, fixed)

    out = pl.pallas_call(
        net_kernel,
        out_shape=jax.ShapeDtypeStruct((G, B, OUT_PAD), jnp.float32),
        grid=(G,),
        in_specs=[
            pl.BlockSpec((None, B, IN_PAD), grp),
            w_spec((IN_PAD, HID_PAD)), w_spec((1, HID_PAD)),
            w_spec((HID_PAD, HID_PAD)), w_spec((1, HID_PAD)),
            w_spec((HID_PAD, HID_PAD)), w_spec((1, HID_PAD)),
            w_spec((HID_PAD, OUT_PAD)), w_spec((1, OUT_PAD)),
        ],
        out_specs=pl.BlockSpec((None, B, OUT_PAD), grp),
        compiler_params=pltpu.CompilerParams(
            # Groups are independent -> shard across TensorCores on v7x.
            dimension_semantics=("parallel",)),
    )(xp, padded["w1"], padded["b1"], padded["w2"], padded["b2"],
      padded["w3"], padded["b3"], padded["w4"], padded["b4"])

    out = out[..., :OUT_DIM]
    return out[0] if squeeze else out


def init_params(key):
    """Deterministic init mimicking PyTorch nn.Linear default (uniform +/-1/sqrt(fan_in))."""
    dims = [(IN_DIM, HID_DIM), (HID_DIM, HID_DIM), (HID_DIM, HID_DIM), (HID_DIM, OUT_DIM)]
    params = {}
    for idx, (fan_in, fan_out) in enumerate(dims, start=1):
        key, kw, kb = jax.random.split(key, 3)
        bound = 1.0 / jnp.sqrt(fan_in)
        params[f"w{idx}"] = jax.random.uniform(
            kw, (fan_in, fan_out), jnp.float32, -bound, bound)
        params[f"b{idx}"] = jax.random.uniform(
            kb, (1, fan_out), jnp.float32, -bound, bound)
    return params


def _dot_hp(a, b):
    # Pin precision so the reference matches Mosaic's multi-pass f32 matmul.
    return jnp.dot(a, b, precision=lax.Precision.HIGHEST)


def reference_forward(x, params):
    """Pure-JAX reference of NetBatchNorm.forward (eval mode), unpadded."""
    h = _batch_norm_ref(_leaky_relu(_dot_hp(x, params["w1"]) + params["b1"]))
    h = _batch_norm_ref(_leaky_relu(_dot_hp(h, params["w2"]) + params["b2"]))
    h = _batch_norm_ref(_leaky_relu(_dot_hp(h, params["w3"]) + params["b3"]))
    return _dot_hp(h, params["w4"]) + params["b4"]


if __name__ == "__main__":
    key = jax.random.PRNGKey(0)
    key, kx, kxg = jax.random.split(key, 3)

    B = 8  # batch; input feature dim fixed at 248 by nn.Linear(248, 64)
    params = init_params(key)
    padded = pad_params(params)          # padded once, reused across calls

    # --- single forward (2-D input) ---
    x = jax.random.normal(kx, (B, 248), dtype=jnp.float32)
    out = jax.block_until_ready(net_batchnorm_forward(x, padded))
    ref = reference_forward(x, params)
    assert out.shape == (B, 3)
    assert jnp.allclose(out, ref, atol=1e-4, rtol=1e-4), "mismatch vs JAX reference"

    # --- multiple independent forwards fused into one pallas_call (grid) ---
    G = 2
    xg = jax.random.normal(kxg, (G, B, 248), dtype=jnp.float32)
    outg = jax.block_until_ready(net_batchnorm_forward(xg, padded))
    refg = jax.vmap(reference_forward, in_axes=(0, None))(xg, params)
    assert outg.shape == (G, B, 3)
    assert jnp.allclose(outg, refg, atol=1e-4, rtol=1e-4), "grouped mismatch vs JAX reference"

    print("KERNEL_OK")
</pallas_src>

<mosaic_0001>
module attributes {stable_mosaic.version = 11 : i64} {
  func.func @net_kernel(%arg0: i32, %arg1: memref<1x8x256xf32, #tpu.memory_space<vmem>>, %arg2: memref<256x128xf32, #tpu.memory_space<vmem>>, %arg3: memref<1x128xf32, #tpu.memory_space<vmem>>, %arg4: memref<128x128xf32, #tpu.memory_space<vmem>>, %arg5: memref<1x128xf32, #tpu.memory_space<vmem>>, %arg6: memref<128x128xf32, #tpu.memory_space<vmem>>, %arg7: memref<1x128xf32, #tpu.memory_space<vmem>>, %arg8: memref<128x128xf32, #tpu.memory_space<vmem>>, %arg9: memref<1x128xf32, #tpu.memory_space<vmem>>, %arg10: memref<1x8x128xf32, #tpu.memory_space<vmem>>) attributes {dimension_semantics = [#tpu.dimension_semantics<parallel>], iteration_bounds = array<i64: 1>, scalar_prefetch = 0 : i64, scratch_operands = 0 : i64, tpu.core_type = #tpu.core_type<tc>, window_params = [{transform_indices = @transform_0, window_bounds = array<i64: 1, 8, 256>}, {pipeline_mode = #tpu.pipeline_mode<synchronous>, transform_indices = @transform_1, window_bounds = array<i64: 256, 128>}, {pipeline_mode = #tpu.pipeline_mode<synchronous>, transform_indices = @transform_2, window_bounds = array<i64: 1, 128>}, {pipeline_mode = #tpu.pipeline_mode<synchronous>, transform_indices = @transform_3, window_bounds = array<i64: 128, 128>}, {pipeline_mode = #tpu.pipeline_mode<synchronous>, transform_indices = @transform_4, window_bounds = array<i64: 1, 128>}, {pipeline_mode = #tpu.pipeline_mode<synchronous>, transform_indices = @transform_5, window_bounds = array<i64: 128, 128>}, {pipeline_mode = #tpu.pipeline_mode<synchronous>, transform_indices = @transform_6, window_bounds = array<i64: 1, 128>}, {pipeline_mode = #tpu.pipeline_mode<synchronous>, transform_indices = @transform_7, window_bounds = array<i64: 128, 128>}, {pipeline_mode = #tpu.pipeline_mode<synchronous>, transform_indices = @transform_8, window_bounds = array<i64: 1, 128>}, {transform_indices = @transform_9, window_bounds = array<i64: 1, 8, 128>}]} {
    %c0 = arith.constant 0 : index
    %c0_0 = arith.constant 0 : index
    %c0_1 = arith.constant 0 : index
    %0 = vector.load %arg1[%c0, %c0_0, %c0_1] : memref<1x8x256xf32, #tpu.memory_space<vmem>>, vector<1x8x256xf32>
    %1 = vector.shape_cast %0 : vector<1x8x256xf32> to vector<8x256xf32>
    %c0_2 = arith.constant 0 : index
    %c0_3 = arith.constant 0 : index
    %2 = vector.load %arg2[%c0_2, %c0_3] : memref<256x128xf32, #tpu.memory_space<vmem>>, vector<256x128xf32>
    %cst = arith.constant dense<0.000000e+00> : vector<8x128xf32>
    %3 = tpu.matmul %1, %2, %cst {dimension_numbers = #tpu.dot_dimension_numbers<[1], [0], [0], [1], [0, 0, 1, 1], [], []>} : vector<8x256xf32>, vector<256x128xf32>, vector<8x128xf32> -> vector<8x128xf32>
    %c0_4 = arith.constant 0 : index
    %c0_5 = arith.constant 0 : index
    %4 = vector.load %arg3[%c0_4, %c0_5] : memref<1x128xf32, #tpu.memory_space<vmem>>, vector<1x128xf32>
    %5 = vector.broadcast %4 : vector<1x128xf32> to vector<8x128xf32>
    %6 = arith.addf %3, %5 : vector<8x128xf32>
    %cst_6 = arith.constant 0.000000e+00 : f32
    %7 = vector.broadcast %cst_6 : f32 to vector<8x128xf32>
    %8 = arith.cmpf oge, %6, %7 : vector<8x128xf32>
    %cst_7 = arith.constant 0.00999999977 : f32
    %9 = vector.broadcast %cst_7 : f32 to vector<8x128xf32>
    %10 = arith.mulf %9, %6 : vector<8x128xf32>
    %11 = arith.select %8, %6, %10 : vector<8x128xi1>, vector<8x128xf32>
    %cst_8 = arith.constant dense<0.000000e+00> : vector<128xf32>
    %12 = vector.multi_reduction <add>, %11, %cst_8 [0] : vector<8x128xf32> to vector<128xf32>
    %13 = vector.shape_cast %12 : vector<128xf32> to vector<1x128xf32>
    %cst_9 = arith.constant 8.000000e+00 : f32
    %14 = vector.broadcast %cst_9 : f32 to vector<1x128xf32>
    %15 = arith.divf %13, %14 : vector<1x128xf32>
    %16 = vector.broadcast %15 : vector<1x128xf32> to vector<8x128xf32>
    %17 = arith.subf %11, %16 : vector<8x128xf32>
    %18 = arith.mulf %17, %17 : vector<8x128xf32>
    %cst_10 = arith.constant dense<0.000000e+00> : vector<128xf32>
    %19 = vector.multi_reduction <add>, %18, %cst_10 [0] : vector<8x128xf32> to vector<128xf32>
    %20 = vector.shape_cast %19 : vector<128xf32> to vector<1x128xf32>
    %cst_11 = arith.constant 0.142857149 : f32
    %21 = vector.broadcast %cst_11 : f32 to vector<1x128xf32>
    %22 = arith.mulf %20, %21 : vector<1x128xf32>
    %cst_12 = arith.constant 1.000000e-16 : f32
    %23 = vector.broadcast %cst_12 : f32 to vector<1x128xf32>
    %24 = arith.addf %22, %23 : vector<1x128xf32>
    %25 = math.rsqrt %24 : vector<1x128xf32>
    %26 = vector.broadcast %25 : vector<1x128xf32> to vector<8x128xf32>
    %27 = arith.mulf %17, %26 : vector<8x128xf32>
    %c0_13 = arith.constant 0 : index
    %c0_14 = arith.constant 0 : index
    %28 = vector.load %arg4[%c0_13, %c0_14] : memref<128x128xf32, #tpu.memory_space<vmem>>, vector<128x128xf32>
    %cst_15 = arith.constant dense<0.000000e+00> : vector<8x128xf32>
    %29 = tpu.matmul %27, %28, %cst_15 {dimension_numbers = #tpu.dot_dimension_numbers<[1], [0], [0], [1], [0, 0, 1, 1], [], []>} : vector<8x128xf32>, vector<128x128xf32>, vector<8x128xf32> -> vector<8x128xf32>
    %c0_16 = arith.constant 0 : index
    %c0_17 = arith.constant 0 : index
    %30 = vector.load %arg5[%c0_16, %c0_17] : memref<1x128xf32, #tpu.memory_space<vmem>>, vector<1x128xf32>
    %31 = vector.broadcast %30 : vector<1x128xf32> to vector<8x128xf32>
    %32 = arith.addf %29, %31 : vector<8x128xf32>
    %cst_18 = arith.constant 0.000000e+00 : f32
    %33 = vector.broadcast %cst_18 : f32 to vector<8x128xf32>
    %34 = arith.cmpf oge, %32, %33 : vector<8x128xf32>
    %cst_19 = arith.constant 0.00999999977 : f32
    %35 = vector.broadcast %cst_19 : f32 to vector<8x128xf32>
    %36 = arith.mulf %35, %32 : vector<8x128xf32>
    %37 = arith.select %34, %32, %36 : vector<8x128xi1>, vector<8x128xf32>
    %cst_20 = arith.constant dense<0.000000e+00> : vector<128xf32>
    %38 = vector.multi_reduction <add>, %37, %cst_20 [0] : vector<8x128xf32> to vector<128xf32>
    %39 = vector.shape_cast %38 : vector<128xf32> to vector<1x128xf32>
    %cst_21 = arith.constant 8.000000e+00 : f32
    %40 = vector.broadcast %cst_21 : f32 to vector<1x128xf32>
    %41 = arith.divf %39, %40 : vector<1x128xf32>
    %42 = vector.broadcast %41 : vector<1x128xf32> to vector<8x128xf32>
    %43 = arith.subf %37, %42 : vector<8x128xf32>
    %44 = arith.mulf %43, %43 : vector<8x128xf32>
    %cst_22 = arith.constant dense<0.000000e+00> : vector<128xf32>
    %45 = vector.multi_reduction <add>, %44, %cst_22 [0] : vector<8x128xf32> to vector<128xf32>
    %46 = vector.shape_cast %45 : vector<128xf32> to vector<1x128xf32>
    %cst_23 = arith.constant 0.142857149 : f32
    %47 = vector.broadcast %cst_23 : f32 to vector<1x128xf32>
    %48 = arith.mulf %46, %47 : vector<1x128xf32>
    %cst_24 = arith.constant 1.000000e-16 : f32
    %49 = vector.broadcast %cst_24 : f32 to vector<1x128xf32>
    %50 = arith.addf %48, %49 : vector<1x128xf32>
    %51 = math.rsqrt %50 : vector<1x128xf32>
    %52 = vector.broadcast %51 : vector<1x128xf32> to vector<8x128xf32>
    %53 = arith.mulf %43, %52 : vector<8x128xf32>
    %c0_25 = arith.constant 0 : index
    %c0_26 = arith.constant 0 : index
    %54 = vector.load %arg6[%c0_25, %c0_26] : memref<128x128xf32, #tpu.memory_space<vmem>>, vector<128x128xf32>
    %cst_27 = arith.constant dense<0.000000e+00> : vector<8x128xf32>
    %55 = tpu.matmul %53, %54, %cst_27 {dimension_numbers = #tpu.dot_dimension_numbers<[1], [0], [0], [1], [0, 0, 1, 1], [], []>} : vector<8x128xf32>, vector<128x128xf32>, vector<8x128xf32> -> vector<8x128xf32>
    %c0_28 = arith.constant 0 : index
    %c0_29 = arith.constant 0 : index
    %56 = vector.load %arg7[%c0_28, %c0_29] : memref<1x128xf32, #tpu.memory_space<vmem>>, vector<1x128xf32>
    %57 = vector.broadcast %56 : vector<1x128xf32> to vector<8x128xf32>
    %58 = arith.addf %55, %57 : vector<8x128xf32>
    %cst_30 = arith.constant 0.000000e+00 : f32
    %59 = vector.broadcast %cst_30 : f32 to vector<8x128xf32>
    %60 = arith.cmpf oge, %58, %59 : vector<8x128xf32>
    %cst_31 = arith.constant 0.00999999977 : f32
    %61 = vector.broadcast %cst_31 : f32 to vector<8x128xf32>
    %62 = arith.mulf %61, %58 : vector<8x128xf32>
    %63 = arith.select %60, %58, %62 : vector<8x128xi1>, vector<8x128xf32>
    %cst_32 = arith.constant dense<0.000000e+00> : vector<128xf32>
    %64 = vector.multi_reduction <add>, %63, %cst_32 [0] : vector<8x128xf32> to vector<128xf32>
    %65 = vector.shape_cast %64 : vector<128xf32> to vector<1x128xf32>
    %cst_33 = arith.constant 8.000000e+00 : f32
    %66 = vector.broadcast %cst_33 : f32 to vector<1x128xf32>
    %67 = arith.divf %65, %66 : vector<1x128xf32>
    %68 = vector.broadcast %67 : vector<1x128xf32> to vector<8x128xf32>
    %69 = arith.subf %63, %68 : vector<8x128xf32>
    %70 = arith.mulf %69, %69 : vector<8x128xf32>
    %cst_34 = arith.constant dense<0.000000e+00> : vector<128xf32>
    %71 = vector.multi_reduction <add>, %70, %cst_34 [0] : vector<8x128xf32> to vector<128xf32>
    %72 = vector.shape_cast %71 : vector<128xf32> to vector<1x128xf32>
    %cst_35 = arith.constant 0.142857149 : f32
    %73 = vector.broadcast %cst_35 : f32 to vector<1x128xf32>
    %74 = arith.mulf %72, %73 : vector<1x128xf32>
    %cst_36 = arith.constant 1.000000e-16 : f32
    %75 = vector.broadcast %cst_36 : f32 to vector<1x128xf32>
    %76 = arith.addf %74, %75 : vector<1x128xf32>
    %77 = math.rsqrt %76 : vector<1x128xf32>
    %78 = vector.broadcast %77 : vector<1x128xf32> to vector<8x128xf32>
    %79 = arith.mulf %69, %78 : vector<8x128xf32>
    %c0_37 = arith.constant 0 : index
    %c0_38 = arith.constant 0 : index
    %80 = vector.load %arg8[%c0_37, %c0_38] : memref<128x128xf32, #tpu.memory_space<vmem>>, vector<128x128xf32>
    %cst_39 = arith.constant dense<0.000000e+00> : vector<8x128xf32>
    %81 = tpu.matmul %79, %80, %cst_39 {dimension_numbers = #tpu.dot_dimension_numbers<[1], [0], [0], [1], [0, 0, 1, 1], [], []>} : vector<8x128xf32>, vector<128x128xf32>, vector<8x128xf32> -> vector<8x128xf32>
    %c0_40 = arith.constant 0 : index
    %c0_41 = arith.constant 0 : index
    %82 = vector.load %arg9[%c0_40, %c0_41] : memref<1x128xf32, #tpu.memory_space<vmem>>, vector<1x128xf32>
    %83 = vector.broadcast %82 : vector<1x128xf32> to vector<8x128xf32>
    %84 = arith.addf %81, %83 : vector<8x128xf32>
    %c0_42 = arith.constant 0 : index
    %c0_43 = arith.constant 0 : index
    %c0_44 = arith.constant 0 : index
    %85 = vector.load %arg10[%c0_42, %c0_43, %c0_44] : memref<1x8x128xf32, #tpu.memory_space<vmem>>, vector<1x8x128xf32>
    %86 = vector.shape_cast %85 : vector<1x8x128xf32> to vector<8x128xf32>
    %87 = vector.shape_cast %84 : vector<8x128xf32> to vector<1x8x128xf32>
    tpu.vector_store %arg10[%c0_42, %c0_43, %c0_44], %87 {strides = array<i32>} : memref<1x8x128xf32, #tpu.memory_space<vmem>>, vector<1x8x128xf32>,
    return
  }
  func.func @transform_0(%arg0: i32) -> (i32, i32, i32) {
    %c0_i32 = arith.constant 0 : i32
    %c0_i32_0 = arith.constant 0 : i32
    %c0_i32_1 = arith.constant 0 : i32
    return %arg0, %c0_i32, %c0_i32_0 : i32, i32, i32
  }
  func.func @transform_1(%arg0: i32) -> (i32, i32) {
    %c0_i32 = arith.constant 0 : i32
    %c0_i32_0 = arith.constant 0 : i32
    %c0_i32_1 = arith.constant 0 : i32
    return %c0_i32, %c0_i32_0 : i32, i32
  }
  func.func @transform_2(%arg0: i32) -> (i32, i32) {
    %c0_i32 = arith.constant 0 : i32
    %c0_i32_0 = arith.constant 0 : i32
    %c0_i32_1 = arith.constant 0 : i32
    return %c0_i32, %c0_i32_0 : i32, i32
  }
  func.func @transform_3(%arg0: i32) -> (i32, i32) {
    %c0_i32 = arith.constant 0 : i32
    %c0_i32_0 = arith.constant 0 : i32
    %c0_i32_1 = arith.constant 0 : i32
    return %c0_i32, %c0_i32_0 : i32, i32
  }
  func.func @transform_4(%arg0: i32) -> (i32, i32) {
    %c0_i32 = arith.constant 0 : i32
    %c0_i32_0 = arith.constant 0 : i32
    %c0_i32_1 = arith.constant 0 : i32
    return %c0_i32, %c0_i32_0 : i32, i32
  }
  func.func @transform_5(%arg0: i32) -> (i32, i32) {
    %c0_i32 = arith.constant 0 : i32
    %c0_i32_0 = arith.constant 0 : i32
    %c0_i32_1 = arith.constant 0 : i32
    return %c0_i32, %c0_i32_0 : i32, i32
  }
  func.func @transform_6(%arg0: i32) -> (i32, i32) {
    %c0_i32 = arith.constant 0 : i32
    %c0_i32_0 = arith.constant 0 : i32
    %c0_i32_1 = arith.constant 0 : i32
    return %c0_i32, %c0_i32_0 : i32, i32
  }
  func.func @transform_7(%arg0: i32) -> (i32, i32) {
    %c0_i32 = arith.constant 0 : i32
    %c0_i32_0 = arith.constant 0 : i32
    %c0_i32_1 = arith.constant 0 : i32
    return %c0_i32, %c0_i32_0 : i32, i32
  }
  func.func @transform_8(%arg0: i32) -> (i32, i32) {
    %c0_i32 = arith.constant 0 : i32
    %c0_i32_0 = arith.constant 0 : i32
    %c0_i32_1 = arith.constant 0 : i32
    return %c0_i32, %c0_i32_0 : i32, i32
  }
  func.func @transform_9(%arg0: i32) -> (i32, i32, i32) {
    %c0_i32 = arith.constant 0 : i32
    %c0_i32_0 = arith.constant 0 : i32
    %c0_i32_1 = arith.constant 0 : i32
    return %arg0, %c0_i32, %c0_i32_0 : i32, i32, i32
  }
}

</mosaic_0001>

<bundles_post_ra>
// kernel: net_batchnorm_forward.1
= control target key start
LH: loop header
LB: loop body
LE: loop exit
PB: predicated region body
PF: predicated region fallthrough
CT: control target
= control target key end

     0   :  { %14 = vsyncpa [#allocation3], 0  ;;  %s617_s0 = inlined_call_operand.vmem [shape: f32[1,8,256], index: 0, kind: input, shape index: {}]   ;;  %s618_s1 = inlined_call_operand.hbm [shape: f32[256,128], index: 1, kind: input, shape index: {}]   ;;  %s619_s2 = inlined_call_operand.vmem [shape: f32[1,128], index: 2, kind: input, shape index: {}]   ;;  %s620_s3 = inlined_call_operand.hbm [shape: f32[128,128], index: 3, kind: input, shape index: {}]   ;;  %s621_s4 = inlined_call_operand.vmem [shape: f32[1,128], index: 4, kind: input, shape index: {}]   ;;  %s622_s5 = inlined_call_operand.hbm [shape: f32[128,128], index: 5, kind: input, shape index: {}]   ;;  %s623_s6 = inlined_call_operand.vmem [shape: f32[1,128], index: 6, kind: input, shape index: {}]   ;;  %s624_s7 = inlined_call_operand.hbm [shape: f32[128,128], index: 7, kind: input, shape index: {}]   ;;  %s625_s8 = inlined_call_operand.vmem [shape: f32[1,128], index: 8, kind: input, shape index: {}]   ;;  %s626_s9 = inlined_call_operand.vmem [shape: f32[1,8,128], index: 9, kind: output, shape index: {}]  }
   0x1   :  { %15 = vsyncpa [#allocation5], 0 }
   0x2   :  { %16 = vsyncpa [#allocation8], 0  ;;  %s38_s11 = sshll.u32 %s620_s3, 4  ;;  %s522_s12 = smov [#allocation4]   ;;  %s39_s11 = int_to_ptr.hbm [resolvable:$true] %s38_s11 }
   0x3   :  { %s40_s13 = sshll.u32 %s522_s12, 4  ;;  %s23_s16 = sshll.u32 %s618_s1, 4  ;;  %s41_s13 = int_to_ptr.vmem [resolvable:$true] %s40_s13  ;;  %s24_s16 = int_to_ptr.hbm [resolvable:$true] %s23_s16 }
   0x4   :  { %s523_s17 = smov 128   ;;  %s524_s18 = smov 8  }
   0x5   :  { %46 = dma.hbm_to_vmem [thread:$0]  %s39_s11, 2048, %s41_s13, [#allocation5], %s523_s17, %s523_s17, %s524_s18  }
   0x6   :  { %s525_s19 = smov [#allocation2]   ;;  %s53_s23 = sshll.u32 %s622_s5, 4  ;;  %s54_s23 = int_to_ptr.hbm [resolvable:$true] %s53_s23 }
   0x7   :  { %s25_s20 = sshll.u32 %s525_s19, 4  ;;  %s68_s25 = sshll.u32 %s624_s7, 4  ;;  %s26_s20 = int_to_ptr.vmem [resolvable:$true] %s25_s20  ;;  %s69_s25 = int_to_ptr.hbm [resolvable:$true] %s68_s25 }
   0x8   :  { %31 = dma.hbm_to_vmem [thread:$0]  %s24_s16, 4096, %s26_s20, [#allocation3], %s523_s17, %s523_s17, %s524_s18  }
   0x9   :  { %s526_s26 = smov [#allocation6]   ;;  %s527_s1 = smov [#allocation7]  }
   0xa   :  { %s55_s27 = sshll.u32 %s526_s26, 4  ;;  %s70_s28 = sshll.u32 %s527_s1, 4  ;;  %s56_s27 = int_to_ptr.vmem [resolvable:$true] %s55_s27  ;;  %s71_s28 = int_to_ptr.vmem [resolvable:$true] %s70_s28 }
   0xb   :  { %61 = dma.hbm_to_vmem [thread:$0]  %s54_s23, 2048, %s56_s27, [#allocation5], %s523_s17, %s523_s17, %s524_s18  }
   0xc   :  { %76 = dma.hbm_to_vmem [thread:$0]  %s69_s25, 2048, %s71_s28, [#allocation8], %s523_s17, %s523_s17, %s524_s18  }
   0xd   :  { %516 = dma.done.wait [#allocation3], 4096  }
   0xe   :  { %517 = vsyncadd [#allocation3], 4294963200 }
   0xf   :  { %518 = dma.done.wait [#allocation5], 4096  }
  0x10   :  { %519 = vsyncadd [#allocation5], 4294963200 }
  0x11   :  { %520 = dma.done.wait [#allocation8], 2048  }
  0x12   :  { %521 = vsyncadd [#allocation8], 4294965248  ;;  %v112_v0 = vld [vmem:[#allocation2 + $0x78] sm:$0xff]  ;;  %v111_v1 = vld [vmem:[#allocation2 + $0x70] sm:$0xff]  ;;  %v528_v41 = vmov 8.0  }
  0x13   :  { %v128_v2 = vld [vmem:[#allocation2 + $0xf8] sm:$0xff]  ;;  %133 = vmatpush.msra.mxu0 %v112_v0  ;;  %v127_v3 = vld [vmem:[#allocation2 + $0xf0] sm:$0xff]  ;;  %v110_v4 = vld [vmem:[#allocation2 + $0x68] sm:$0xff]  ;;  %412 = vrcp.f32 %v528_v41 }
  0x14   :  { %153 = vmatpush.msra.mxu1 %v128_v2  ;;  %v126_v5 = vld [vmem:[#allocation2 + $0xe8] sm:$0xff]  ;;  %v109_v6 = vld [vmem:[#allocation2 + $0x60] sm:$0xff]  ;;  %v108_v8 = vld [vmem:[#allocation2 + $0x58] sm:$0xff] }
  0x15   :  { %134 = vmatpush.msra.mxu0 %v111_v1  ;;  %v125_v7 = vld [vmem:[#allocation2 + $0xe0] sm:$0xff]  ;;  %v124_v9 = vld [vmem:[#allocation2 + $0xd8] sm:$0xff]  ;;  %v107_v10 = vld [vmem:[#allocation2 + $0x50] sm:$0xff] }
  0x16   :  { %154 = vmatpush.msra.mxu1 %v127_v3  ;;  %v123_v11 = vld [vmem:[#allocation2 + $0xd0] sm:$0xff]  ;;  %v106_v12 = vld [vmem:[#allocation2 + $0x48] sm:$0xff]  ;;  %v105_v14 = vld [vmem:[#allocation2 + $0x40] sm:$0xff] }
  0x17   :  { %135 = vmatpush.msra.mxu0 %v110_v4  ;;  %v122_v13 = vld [vmem:[#allocation2 + $0xc8] sm:$0xff]  ;;  %v121_v15 = vld [vmem:[#allocation2 + $0xc0] sm:$0xff]  ;;  %v104_v16 = vld [vmem:[#allocation2 + $0x38] sm:$0xff] }
  0x18   :  { %155 = vmatpush.msra.mxu1 %v126_v5  ;;  %v120_v17 = vld [vmem:[#allocation2 + $0xb8] sm:$0xff]  ;;  %v103_v18 = vld [vmem:[#allocation2 + $0x30] sm:$0xff]  ;;  %v102_v20 = vld [vmem:[#allocation2 + $0x28] sm:$0xff] }
  0x19   :  { %136 = vmatpush.msra.mxu0 %v109_v6  ;;  %v119_v19 = vld [vmem:[#allocation2 + $0xb0] sm:$0xff]  ;;  %v118_v21 = vld [vmem:[#allocation2 + $0xa8] sm:$0xff]  ;;  %v101_v22 = vld [vmem:[#allocation2 + $0x20] sm:$0xff]  ;;  %v413_v45 = vpop.eup %412 }
  0x1a   :  { %156 = vmatpush.msra.mxu1 %v125_v7  ;;  %v117_v23 = vld [vmem:[#allocation2 + $0xa0] sm:$0xff]  ;;  %v100_v24 = vld [vmem:[#allocation2 + $0x18] sm:$0xff]  ;;  %v99_v26 = vld [vmem:[#allocation2 + $0x10] sm:$0xff]  ;;  %v183_v51 = vmul.f32 8.0, %v413_v45  ;;  %vm187_vm1 = vweird.f32 %v413_v45 }
  0x1b   :  { %137 = vmatpush.msra.mxu0 %v108_v8  ;;  %v116_v25 = vld [vmem:[#allocation2 + $0x98] sm:$0xff]  ;;  %v115_v27 = vld [vmem:[#allocation2 + $0x90] sm:$0xff]  ;;  %v98_v28 = vld [vmem:[#allocation2 + $0x8] sm:$0xff] }
  0x1c   :  { %157 = vmatpush.msra.mxu1 %v124_v9  ;;  %v114_v29 = vld [vmem:[#allocation2 + $0x88] sm:$0xff]  ;;  %v97_v30 = vld [vmem:[#allocation2] sm:$0xff]  ;;  %v226_v34 = vld [vmem:[#allocation4 + $0x78] sm:$0xff]  ;;  %v184_v56 = vsub.f32 1.0, %v183_v51 }
  0x1d   :  { %138 = vmatpush.msra.mxu0 %v107_v10  ;;  %v113_v31 = vld [vmem:[#allocation2 + $0x80] sm:$0xff]  ;;  %v96_v33 = vld [vmem:[%s617_s0 + $0x8] sm:$0xff]  ;;  %v225_v35 = vld [vmem:[#allocation4 + $0x70] sm:$0xff]  ;;  %231 = vmatpush.msra.mxu2 %v226_v34 }
  0x1e   :  { %158 = vmatpush.msra.mxu1 %v123_v11  ;;  %v95_v32 = vld [vmem:[%s617_s0] sm:$0xff]  ;;  %v224_v36 = vld [vmem:[#allocation4 + $0x68] sm:$0xff]  ;;  %v222_v38 = vld [vmem:[#allocation4 + $0x58] sm:$0xff]  ;;  %v185_v61 = vmul.f32 %v413_v45, %v184_v56 }
  0x1f   :  { %139 = vmatpush.msra.mxu0 %v106_v12  ;;  %232 = vmatpush.msra.mxu2 %v225_v35  ;;  %v223_v37 = vld [vmem:[#allocation4 + $0x60] sm:$0xff]  ;;  %v221_v39 = vld [vmem:[#allocation4 + $0x50] sm:$0xff]  ;;  %v220_v40 = vld [vmem:[#allocation4 + $0x48] sm:$0xff] }
  0x20   :  { %159 = vmatpush.msra.mxu1 %v122_v13  ;;  %v219_v42 = vld [vmem:[#allocation4 + $0x40] sm:$0xff]  ;;  %v218_v43 = vld [vmem:[#allocation4 + $0x38] sm:$0xff]  ;;  %v217_v46 = vld [vmem:[#allocation4 + $0x30] sm:$0xff]  ;;  %v186_v1 = vadd.f32 %v413_v45, %v185_v61 }
  0x21   :  { %140 = vmatpush.msra.mxu0 %v105_v14  ;;  %233 = vmatpush.msra.mxu2 %v224_v36  ;;  %v408_v44 = vld [vmem:[%s619_s2] ss:$0 sm:$0xff]  ;;  %v216_v49 = vld [vmem:[#allocation4 + $0x28] sm:$0xff]  ;;  %v214_v54 = vld [vmem:[#allocation4 + $0x18] sm:$0xff] }
  0x22   :  { %160 = vmatpush.msra.mxu1 %v121_v15  ;;  %v215_v52 = vld [vmem:[#allocation4 + $0x20] sm:$0xff]  ;;  %v213_v57 = vld [vmem:[#allocation4 + $0x10] sm:$0xff]  ;;  %v212_v60 = vld [vmem:[#allocation4 + $0x8] sm:$0xff]  ;;  %v600_v4 = vsel %vm187_vm1, %v413_v45, %v186_v1 }
  0x23   :  { %141 = vmatpush.msra.mxu0 %v104_v16  ;;  %234 = vmatpush.msra.mxu2 %v223_v37  ;;  %v211_v63 = vld [vmem:[#allocation4] sm:$0xff]  ;;  %v288_v34 = vld [vmem:[#allocation6 + $0x30] sm:$0xff]  ;;  %v287_v36 = vld [vmem:[#allocation6 + $0x28] sm:$0xff] }
  0x24   :  { %161 = vmatpush.msra.mxu1 %v120_v17  ;;  %v409_v35 = vld [vmem:[%s621_s4] ss:$0 sm:$0xff]  ;;  %v283_v45 = vld [vmem:[#allocation6 + $0x8] sm:$0xff] }
  0x25   :  { %142 = vmatpush.msra.mxu0 %v103_v18  ;;  %235 = vmatpush.msra.mxu2 %v222_v38  ;;  %v286_v38 = vld [vmem:[#allocation6 + $0x20] sm:$0xff] }
  0x26   :  { %162 = vmatpush.msra.mxu1 %v119_v19 }
  0x27   :  { %143 = vmatpush.msra.mxu0 %v102_v20  ;;  %236 = vmatpush.msra.mxu2 %v221_v39 }
  0x28   :  { %163 = vmatpush.msra.mxu1 %v118_v21 }
  0x29   :  { %144 = vmatpush.msra.mxu0 %v101_v22  ;;  %237 = vmatpush.msra.mxu2 %v220_v40  ;;  %v285_v40 = vld [vmem:[#allocation6 + $0x18] sm:$0xff] }
  0x2a   :  { %164 = vmatpush.msra.mxu1 %v117_v23 }
  0x2b   :  { %145 = vmatpush.msra.mxu0 %v100_v24  ;;  %238 = vmatpush.msra.mxu2 %v219_v42  ;;  %v284_v42 = vld [vmem:[#allocation6 + $0x10] sm:$0xff] }
  0x2c   :  { %165 = vmatpush.msra.mxu1 %v116_v25  ;;  %v297_v25 = vld [vmem:[#allocation6 + $0x78] sm:$0xff] }
  0x2d   :  { %146 = vmatpush.msra.mxu0 %v99_v26  ;;  %239 = vmatpush.msra.mxu2 %v218_v43  ;;  %v296_v26 = vld [vmem:[#allocation6 + $0x70] sm:$0xff] }
  0x2e   :  { %166 = vmatpush.msra.mxu1 %v115_v27  ;;  %302 = vmatpush.msra.mxu3 %v297_v25  ;;  %v295_v27 = vld [vmem:[#allocation6 + $0x68] sm:$0xff] }
  0x2f   :  { %147 = vmatpush.msra.mxu0 %v98_v28  ;;  %240 = vmatpush.msra.mxu2 %v217_v46  ;;  %v294_v28 = vld [vmem:[#allocation6 + $0x60] sm:$0xff] }
  0x30   :  { %167 = vmatpush.msra.mxu1 %v114_v29  ;;  %303 = vmatpush.msra.mxu3 %v296_v26  ;;  %v293_v29 = vld [vmem:[#allocation6 + $0x58] sm:$0xff] }
  0x31   :  { %148 = vmatpush.msra.mxu0 %v97_v30  ;;  %241 = vmatpush.msra.mxu2 %v216_v49  ;;  %v292_v30 = vld [vmem:[#allocation6 + $0x50] sm:$0xff] }
  0x32   :  { %168 = vmatpush.msra.mxu1 %v113_v31  ;;  %149 = vmatmul.f32.vlgmr.msra.gmra.mxu0 %v95_v32  ;;  %v291_v31 = vld [vmem:[#allocation6 + $0x48] sm:$0xff]  ;;  %v290_v32 = vld [vmem:[#allocation6 + $0x40] sm:$0xff] }
  0x33   :  { %169 = vmatmul.f32.vlgmr.msra.gmra.mxu1 %v96_v33  ;;  %242 = vmatpush.msra.mxu2 %v215_v52  ;;  %v289_v33 = vld [vmem:[#allocation6 + $0x38] sm:$0xff] }
  0x34   :  { %304 = vmatpush.msra.mxu3 %v295_v27  ;;  %v355_v27 = vld [vmem:[#allocation7 + $0x10] sm:$0xff] }
  0x35   :  { %243 = vmatpush.msra.mxu2 %v214_v54 }
  0x36   :  { %305 = vmatpush.msra.mxu3 %v294_v28 }
  0x37   :  { %244 = vmatpush.msra.mxu2 %v213_v57 }
  0x38   :  { %306 = vmatpush.msra.mxu3 %v293_v29  ;;  %v354_v29 = vld [vmem:[#allocation7 + $0x8] sm:$0xff] }
  0x39   :  { %245 = vmatpush.msra.mxu2 %v212_v60 }
  0x3a   :  { %307 = vmatpush.msra.mxu3 %v292_v30 }
  0x3b   :  { %246 = vmatpush.msra.mxu2 %v211_v63 }
  0x3c   :  { %308 = vmatpush.msra.mxu3 %v291_v31  ;;  %v353_v31 = vld [vmem:[#allocation7] sm:$0xff] }
  0x3e   :  { %309 = vmatpush.msra.mxu3 %v290_v32 }
  0x40   :  { %310 = vmatpush.msra.mxu3 %v289_v33 }
  0x42   :  { %311 = vmatpush.msra.mxu3 %v288_v34 }
  0x44   :  { %312 = vmatpush.msra.mxu3 %v287_v36 }
  0x46   :  { %313 = vmatpush.msra.mxu3 %v286_v38 }
  0x48   :  { %314 = vmatpush.msra.mxu3 %v285_v40 }
  0x4a   :  { %315 = vmatpush.msra.mxu3 %v284_v42 }
  0x4c   :  { %316 = vmatpush.msra.mxu3 %v283_v45 }
  0xaf   :  { %v150_v47 = vpop.f32.mrf.mxu0 }
  0xb0   :  { %v170_v48 = vpop.f32.mrf.mxu1  ;;  %v151_v50 = vadd.f32 %v408_v44, %v150_v47  ;;  %v282_v47 = vld [vmem:[#allocation6] sm:$0xff] }
  0xb1   :  { %317 = vmatpush.msra.mxu3 %v282_v47 }
  0xb2   :  { %v171_v53 = vadd.f32 %v170_v48, %v151_v50 }
  0xb4   :  { %vm173_vm0 = vcmp.ge.f32.partialorder %v171_v53, 0.0  ;;  %v174_v55 = vmul.f32 0.01, %v171_v53 }
  0xb6   :  { %v175_v58 = vsel %vm173_vm0, %v171_v53, %v174_v55 }
  0xb7   :  { %v176_v59 = vrot.slane %v175_v58, 4 }
  0xb9   :  { %v177_v62 = vadd.f32 %v176_v59, %v175_v58 }
  0xbb   :  { %v178_v0 = vrot.slane %v177_v62, 2 }
  0xbd   :  { %v179_v2 = vadd.f32 %v178_v0, %v177_v62 }
  0xbf   :  { %v180_v3 = vrot.slane %v179_v2, 1 }
  0xc1   :  { %v181_v5 = vadd.f32 %v180_v3, %v179_v2 }
  0xc3   :  { %v189_v6 = vmul.f32 %v600_v4, %v181_v5 }
  0xc5   :  { %v190_v7 = vsub.f32 %v175_v58, %v189_v6 }
  0xc7   :  { %v191_v8 = vmul.f32 %v190_v7, %v190_v7 }
  0xc9   :  { %v192_v9 = vrot.slane %v191_v8, 4 }
  0xcb   :  { %v193_v10 = vadd.f32 %v192_v9, %v191_v8  ;;  %v368_v8 = vld [vmem:[#allocation7 + $0x78] sm:$0xff]  ;;  %v367_v9 = vld [vmem:[#allocation7 + $0x70] sm:$0xff] }
  0xcc   :  { %373 = vmatpush.msrb.mxu0 %v368_v8 }
  0xcd   :  { %v194_v11 = vrot.slane %v193_v10, 2 }
  0xce   :  { %374 = vmatpush.msrb.mxu0 %v367_v9 }
  0xcf   :  { %v195_v12 = vadd.f32 %v194_v11, %v193_v10  ;;  %v366_v10 = vld [vmem:[#allocation7 + $0x68] sm:$0xff]  ;;  %v365_v11 = vld [vmem:[#allocation7 + $0x60] sm:$0xff] }
  0xd0   :  { %375 = vmatpush.msrb.mxu0 %v366_v10 }
  0xd1   :  { %v196_v13 = vrot.slane %v195_v12, 1 }
  0xd2   :  { %376 = vmatpush.msrb.mxu0 %v365_v11 }
  0xd3   :  { %v197_v14 = vadd.f32 %v196_v13, %v195_v12  ;;  %v364_v12 = vld [vmem:[#allocation7 + $0x58] sm:$0xff]  ;;  %v363_v13 = vld [vmem:[#allocation7 + $0x50] sm:$0xff] }
  0xd4   :  { %377 = vmatpush.msrb.mxu0 %v364_v12 }
  0xd5   :  { %v198_v15 = vmul.f32 0.14285715, %v197_v14  ;;  %v362_v14 = vld [vmem:[#allocation7 + $0x48] sm:$0xff] }
  0xd6   :  { %378 = vmatpush.msrb.mxu0 %v363_v13 }
  0xd7   :  { %v199_v16 = vadd.f32 1e-16, %v198_v15  ;;  %v361_v15 = vld [vmem:[#allocation7 + $0x40] sm:$0xff] }
  0xd8   :  { %379 = vmatpush.msrb.mxu0 %v362_v14 }
  0xd9   :  { %414 = vrsqrt.f32 %v199_v16  ;;  %vm206_vm3 = vweird.f32 %v199_v16 }
  0xda   :  { %380 = vmatpush.msrb.mxu0 %v361_v15 }
  0xdf   :  { %v415_v17 = vpop.eup %414 }
  0xe0   :  { %v201_v18 = vmul.f32 %v415_v17, %v199_v16  ;;  %vm207_vm2 = vweird.f32 %v415_v17  ;;  %v360_v16 = vld [vmem:[#allocation7 + $0x38] sm:$0xff] }
  0xe1   :  { %vm208_vm4 = vmor %vm206_vm3, %vm207_vm2  ;;  %381 = vmatpush.msrb.mxu0 %v360_v16 }
  0xe2   :  { %v202_v19 = vmul.f32 %v415_v17, %v201_v18  ;;  %v359_v18 = vld [vmem:[#allocation7 + $0x30] sm:$0xff] }
  0xe3   :  { %382 = vmatpush.msrb.mxu0 %v359_v18 }
  0xe4   :  { %v203_v20 = vmul.f32 0.5, %v202_v19 }
  0xe6   :  { %v204_v21 = vsub.f32 1.5, %v203_v20  ;;  %v358_v20 = vld [vmem:[#allocation7 + $0x28] sm:$0xff] }
  0xe7   :  { %383 = vmatpush.msrb.mxu0 %v358_v20 }
  0xe8   :  { %v205_v22 = vmul.f32 %v415_v17, %v204_v21 }
  0xea   :  { %v209_v23 = vsel %vm208_vm4, %v415_v17, %v205_v22  ;;  %v410_v17 = vld [vmem:[%s623_s6] ss:$0 sm:$0xff] }
  0xeb   :  { %v210_v24 = vmul.f32 %v209_v23, %v190_v7  ;;  %v357_v22 = vld [vmem:[#allocation7 + $0x20] sm:$0xff] }
  0xec   :  { %384 = vmatpush.msrb.mxu0 %v357_v22 }
  0xed   :  { %247 = vmatmul.f32.vlgmr.msra.gmra.mxu2 %v210_v24  ;;  %v356_v24 = vld [vmem:[#allocation7 + $0x18] sm:$0xff] }
  0xee   :  { %385 = vmatpush.msrb.mxu0 %v356_v24 }
  0xf0   :  { %386 = vmatpush.msrb.mxu0 %v355_v27 }
  0xf2   :  { %387 = vmatpush.msrb.mxu0 %v354_v29 }
  0xf4   :  { %388 = vmatpush.msrb.mxu0 %v353_v31 }
 0x170   :  { %v248_v37 = vpop.f32.mrf.mxu2 }
 0x171   :  { %v249_v39 = vadd.f32 %v409_v35, %v248_v37 }
 0x173   :  { %vm251_vm5 = vcmp.ge.f32.partialorder %v249_v39, 0.0  ;;  %v252_v41 = vmul.f32 0.01, %v249_v39 }
 0x175   :  { %v253_v43 = vsel %vm251_vm5, %v249_v39, %v252_v41 }
 0x176   :  { %v254_v44 = vrot.slane %v253_v43, 4 }
 0x178   :  { %v255_v46 = vadd.f32 %v254_v44, %v253_v43 }
 0x17a   :  { %v256_v48 = vrot.slane %v255_v46, 2 }
 0x17c   :  { %v257_v49 = vadd.f32 %v256_v48, %v255_v46 }
 0x17e   :  { %v258_v50 = vrot.slane %v257_v49, 1 }
 0x180   :  { %v259_v51 = vadd.f32 %v258_v50, %v257_v49 }
 0x182   :  { %v260_v52 = vmul.f32 %v259_v51, %v600_v4 }
 0x184   :  { %v261_v53 = vsub.f32 %v253_v43, %v260_v52 }
 0x186   :  { %v262_v54 = vmul.f32 %v261_v53, %v261_v53 }
 0x188   :  { %v263_v55 = vrot.slane %v262_v54, 4 }
 0x18a   :  { %v264_v56 = vadd.f32 %v263_v55, %v262_v54 }
 0x18c   :  { %v265_v57 = vrot.slane %v264_v56, 2 }
 0x18e   :  { %v266_v58 = vadd.f32 %v265_v57, %v264_v56 }
 0x190   :  { %v267_v59 = vrot.slane %v266_v58, 1 }
 0x192   :  { %v268_v60 = vadd.f32 %v267_v59, %v266_v58 }
 0x194   :  { %v269_v61 = vmul.f32 0.14285715, %v268_v60 }
 0x196   :  { %v270_v62 = vadd.f32 1e-16, %v269_v61 }
 0x198   :  { %416 = vrsqrt.f32 %v270_v62  ;;  %vm277_vm7 = vweird.f32 %v270_v62 }
 0x19e   :  { %v417_v63 = vpop.eup %416 }
 0x19f   :  { %v272_v0 = vmul.f32 %v417_v63, %v270_v62  ;;  %vm278_vm6 = vweird.f32 %v417_v63 }
 0x1a0   :  { %vm279_vm8 = vmor %vm277_vm7, %vm278_vm6 }
 0x1a1   :  { %v273_v1 = vmul.f32 %v417_v63, %v272_v0 }
 0x1a3   :  { %v274_v2 = vmul.f32 0.5, %v273_v1 }
 0x1a5   :  { %v275_v3 = vsub.f32 1.5, %v274_v2 }
 0x1a7   :  { %v276_v5 = vmul.f32 %v417_v63, %v275_v3 }
 0x1a9   :  { %v280_v6 = vsel %vm279_vm8, %v417_v63, %v276_v5 }
 0x1aa   :  { %v281_v7 = vmul.f32 %v280_v6, %v261_v53  ;;  %v411_v53 = vld [vmem:[%s625_s8] ss:$0 sm:$0xff] }
 0x1ac   :  { %318 = vmatmul.f32.vlgmr.msra.gmra.mxu3 %v281_v7 }
 0x22f   :  { %v319_v19 = vpop.f32.mrf.mxu3 }
 0x230   :  { %v320_v21 = vadd.f32 %v410_v17, %v319_v19 }
 0x232   :  { %vm322_vm9 = vcmp.ge.f32.partialorder %v320_v21, 0.0  ;;  %v323_v23 = vmul.f32 0.01, %v320_v21 }
 0x234   :  { %v324_v25 = vsel %vm322_vm9, %v320_v21, %v323_v23 }
 0x235   :  { %v325_v26 = vrot.slane %v324_v25, 4 }
 0x237   :  { %v326_v28 = vadd.f32 %v325_v26, %v324_v25 }
 0x239   :  { %v327_v30 = vrot.slane %v326_v28, 2 }
 0x23b   :  { %v328_v32 = vadd.f32 %v327_v30, %v326_v28 }
 0x23d   :  { %v329_v33 = vrot.slane %v328_v32, 1 }
 0x23f   :  { %v330_v34 = vadd.f32 %v329_v33, %v328_v32 }
 0x241   :  { %v331_v35 = vmul.f32 %v330_v34, %v600_v4 }
 0x243   :  { %v332_v36 = vsub.f32 %v324_v25, %v331_v35 }
 0x245   :  { %v333_v37 = vmul.f32 %v332_v36, %v332_v36 }
 0x247   :  { %v334_v38 = vrot.slane %v333_v37, 4 }
 0x249   :  { %v335_v39 = vadd.f32 %v334_v38, %v333_v37 }
 0x24b   :  { %v336_v40 = vrot.slane %v335_v39, 2 }
 0x24d   :  { %v337_v41 = vadd.f32 %v336_v40, %v335_v39 }
 0x24f   :  { %v338_v42 = vrot.slane %v337_v41, 1 }
 0x251   :  { %v339_v43 = vadd.f32 %v338_v42, %v337_v41 }
 0x253   :  { %v340_v44 = vmul.f32 0.14285715, %v339_v43 }
 0x255   :  { %v341_v45 = vadd.f32 1e-16, %v340_v44 }
 0x257   :  { %418 = vrsqrt.f32 %v341_v45  ;;  %vm348_vm11 = vweird.f32 %v341_v45 }
 0x25d   :  { %v419_v46 = vpop.eup %418 }
 0x25e   :  { %v343_v47 = vmul.f32 %v419_v46, %v341_v45  ;;  %vm349_vm10 = vweird.f32 %v419_v46 }
 0x25f   :  { %vm350_vm12 = vmor %vm348_vm11, %vm349_vm10 }
 0x260   :  { %v344_v48 = vmul.f32 %v419_v46, %v343_v47 }
 0x262   :  { %v345_v49 = vmul.f32 0.5, %v344_v48 }
 0x264   :  { %v346_v50 = vsub.f32 1.5, %v345_v49 }
 0x266   :  { %v347_v51 = vmul.f32 %v419_v46, %v346_v50 }
 0x268   :  { %v351_v4 = vsel %vm350_vm12, %v419_v46, %v347_v51 }
 0x269   :  { %v352_v52 = vmul.f32 %v351_v4, %v332_v36 }
 0x26b   :  { %389 = vmatmul.f32.vlgmr.msrb.gmra.mxu0 %v352_v52 }
 0x2e8   :  { %v390_v54 = vpop.f32.mrf.mxu0 }
 0x2e9   :  { %v391_v55 = vadd.f32 %v411_v53, %v390_v54 }
 0x2eb   :  { %393 = vst [vmem:[%s626_s9] sm:$0xff] %v391_v55 }
 0x2ec   :  { %398 = vsyncpa [#allocation3], 1 }
 0x2ed   :  { %399 = vsyncpa [#allocation5], 1 }
 0x2ee   :  { %400 = vsyncpa [#allocation8], 1 }

</bundles_post_ra>
